<compile_context>
chip_gen: v5e
topology: v5e:2x2
jax: 0.10.0
libtpu: 0.0.40
codegen_flags: <defaults>
</compile_context>

<pallas_src>
import math

import jax
import jax.numpy as jnp
from jax.experimental import pallas as pl
from jax.experimental.pallas import tpu as pltpu


# ----------------------------------------------------------------------------
# Kernel: fused (Linear -> leaky_relu) x2 -> Linear -> sigmoid, transposed
# layout (features on sublanes, batch on lanes).
# ----------------------------------------------------------------------------
def _discriminator_kernel(xT_ref, w1_ref, b1_ref, w2_ref, b2_ref, w3_ref, b3_ref,
                          oT_ref):
    cdt = w1_ref.dtype  # compute dtype for MXU operands (f32 or bf16)

    # layer 1: h = W1 @ x^T + b1 ; leaky_relu(0.2)        -> [f0, TB] f32
    h = jnp.dot(w1_ref[...], xT_ref[...],
                preferred_element_type=jnp.float32) + b1_ref[...]
    h = jnp.where(h > 0, h, 0.2 * h)

    # layer 2: h = W2 @ h + b2 ; leaky_relu(0.2)          -> [f1, TB] f32
    h = jnp.dot(w2_ref[...], h.astype(cdt),
                preferred_element_type=jnp.float32) + b2_ref[...]
    h = jnp.where(h > 0, h, 0.2 * h)

    # output layer: z = W3 @ h + b3 ; sigmoid             -> [n_out, TB]
    z = jnp.dot(w3_ref[...], h.astype(cdt),
                preferred_element_type=jnp.float32) + b3_ref[...]
    oT_ref[...] = jax.nn.sigmoid(z).astype(oT_ref.dtype)


# ----------------------------------------------------------------------------
# Wrapper
# ----------------------------------------------------------------------------
def discriminator_forward(x, params, *, block_b=1024, compute_dtype=jnp.float32):
    """Forward pass of the GAIL discriminator.

    x      : [B, n_input] float32 (batch-major, PyTorch convention).
    params : dict with PyTorch-layout weights w{1,2,3}: [out, in] and column
             biases b{1,2,3}: [out, 1].
    Returns: [B, n_output] float32 probabilities.
    """
    assert block_b % 128 == 0, "block_b must be a multiple of 128 lanes"

    w1, b1 = params["w1"], params["b1"]
    w2, b2 = params["w2"], params["b2"]
    w3, b3 = params["w3"], params["b3"]

    B, n_in = x.shape
    f0 = w1.shape[0]
    f1 = w2.shape[0]
    n_out = w3.shape[0]

    # Batch tile: always lane-dense (multiple of 128), capped at block_b.
    tb = min(block_b, 128 * pl.cdiv(B, 128))
    nb = pl.cdiv(B, tb)
    B_pad = nb * tb

    # Batch-on-lane layout: x^T is [n_input, B_pad].
    xT = x.T
    if B_pad != B:
        xT = jnp.pad(xT, ((0, 0), (0, B_pad - B)))
    xT = xT.astype(compute_dtype)

    # MXU operands in compute_dtype; biases stay f32 (added post-accumulation).
    w1c = w1.astype(compute_dtype)
    w2c = w2.astype(compute_dtype)
    w3c = w3.astype(compute_dtype)

    def resident(arr):
        # Full-array block, same block every grid step -> stays VMEM-resident.
        return pl.BlockSpec(arr.shape, lambda i: (0,) * arr.ndim)

    itemsize = jnp.dtype(compute_dtype).itemsize
    cost = pl.CostEstimate(
        flops=2 * B_pad * (n_in * f0 + f0 * f1 + f1 * n_out)
        + 3 * B_pad * (f0 + f1 + n_out),
        transcendentals=B_pad * n_out,
        bytes_accessed=(xT.size + w1.size + w2.size + w3.size) * itemsize
        + (b1.size + b2.size + b3.size) * 4
        + n_out * B_pad * 4,
    )

    outT = pl.pallas_call(
        _discriminator_kernel,
        out_shape=jax.ShapeDtypeStruct((n_out, B_pad), jnp.float32),
        grid=(nb,),
        in_specs=[
            pl.BlockSpec((n_in, tb), lambda i: (0, i)),   # x^T, tiled on batch
            resident(w1c), resident(b1),
            resident(w2c), resident(b2),
            resident(w3c), resident(b3),
        ],
        out_specs=pl.BlockSpec((n_out, tb), lambda i: (0, i)),
        compiler_params=pltpu.CompilerParams(
            dimension_semantics=("parallel",),
        ),
        cost_estimate=cost,
    )(xT, w1c, b1, w2c, b2, w3c, b3)

    # Back to the PyTorch [B, n_output] convention.
    return outT[:, :B].T


# ----------------------------------------------------------------------------
# Deterministic parameter init (mirrors the PyTorch __init__ semantics)
# Weights are stored in PyTorch layout [out_features, in_features];
# biases as column vectors [out_features, 1].
# ----------------------------------------------------------------------------
def _xavier_uniform(key, fan_in, fan_out, gain):
    bound = gain * math.sqrt(6.0 / (fan_in + fan_out))
    return jax.random.uniform(key, (fan_out, fan_in), jnp.float32, -bound, bound)


def _bias_uniform(key, fan_in, fan_out):
    # PyTorch nn.Linear default bias init: U(-1/sqrt(fan_in), 1/sqrt(fan_in))
    bound = 1.0 / math.sqrt(fan_in)
    return jax.random.uniform(key, (fan_out, 1), jnp.float32, -bound, bound)


def make_params(key, n_input, n_features, n_output):
    leaky_gain = math.sqrt(2.0 / (1.0 + 0.01 ** 2))  # calculate_gain('leaky_relu')
    sigmoid_gain = 1.0                               # calculate_gain('sigmoid')
    k = jax.random.split(key, 6)
    return {
        "w1": _xavier_uniform(k[0], n_input, n_features[0], leaky_gain),
        "b1": _bias_uniform(k[1], n_input, n_features[0]),
        "w2": _xavier_uniform(k[2], n_features[0], n_features[1], leaky_gain),
        "b2": _bias_uniform(k[3], n_features[0], n_features[1]),
        "w3": _xavier_uniform(k[4], n_features[1], n_output, sigmoid_gain),
        "b3": _bias_uniform(k[5], n_features[1], n_output),
    }


# Pure-JAX reference for correctness check (batch-major, like PyTorch).
def _reference_forward(x, p):
    h = x @ p["w1"].T + p["b1"].T
    h = jnp.where(h > 0, h, 0.2 * h)
    h = h @ p["w2"].T + p["b2"].T
    h = jnp.where(h > 0, h, 0.2 * h)
    return jax.nn.sigmoid(h @ p["w3"].T + p["b3"].T)


if __name__ == "__main__":
    # GAIL pendulum: discriminator input = (state, action) = 3 + 1 = 4 features,
    # hidden features (32, 32), scalar output.
    n_input = 4
    n_features = (32, 32)
    n_output = 1

    key = jax.random.PRNGKey(0)
    k_params, k_x1, k_x2, k_x3 = jax.random.split(key, 4)
    params = make_params(k_params, n_input, n_features, n_output)

    # Case 1: large, tile-aligned batch (lane-dense, multi-step grid), f32 path.
    B1 = 2048
    x1 = jax.random.normal(k_x1, (B1, n_input), dtype=jnp.float32)
    out1 = jax.block_until_ready(
        discriminator_forward(x1, params, block_b=1024, compute_dtype=jnp.float32))
    ref1 = _reference_forward(x1, params)
    assert out1.shape == (B1, n_output)
    assert jnp.allclose(out1, ref1, atol=1e-5, rtol=1e-5)

    # Case 2: small batch -> padded to one lane-dense 128-wide tile.
    B2 = 8
    x2 = jax.random.normal(k_x2, (B2, n_input), dtype=jnp.float32)
    out2 = jax.block_until_ready(
        discriminator_forward(x2, params, block_b=1024, compute_dtype=jnp.float32))
    ref2 = _reference_forward(x2, params)
    assert out2.shape == (B2, n_output)
    assert jnp.allclose(out2, ref2, atol=1e-5, rtol=1e-5)

    # Case 3: ragged batch (not a multiple of 128) exercises the pad/slice path.
    B3 = 300
    x3 = jax.random.normal(k_x3, (B3, n_input), dtype=jnp.float32)
    out3 = jax.block_until_ready(
        discriminator_forward(x3, params, block_b=1024, compute_dtype=jnp.float32))
    ref3 = _reference_forward(x3, params)
    assert out3.shape == (B3, n_output)
    assert jnp.allclose(out3, ref3, atol=1e-5, rtol=1e-5)

    # Case 4: bf16 MXU operands with f32 accumulation (looser tolerance).
    out4 = jax.block_until_ready(
        discriminator_forward(x1, params, block_b=1024, compute_dtype=jnp.bfloat16))
    assert jnp.allclose(out4, ref1, atol=2e-2, rtol=2e-2)

    print("KERNEL_OK")
</pallas_src>

<mosaic_0001>
module attributes {stable_mosaic.version = 11 : i64} {
  func.func @_discriminator_kernel(%arg0: i32, %arg1: memref<4x1024xf32, #tpu.memory_space<vmem>>, %arg2: memref<32x4xf32, #tpu.memory_space<vmem>>, %arg3: memref<32x1xf32, #tpu.memory_space<vmem>>, %arg4: memref<32x32xf32, #tpu.memory_space<vmem>>, %arg5: memref<32x1xf32, #tpu.memory_space<vmem>>, %arg6: memref<1x32xf32, #tpu.memory_space<vmem>>, %arg7: memref<1x1xf32, #tpu.memory_space<vmem>>, %arg8: memref<1x1024xf32, #tpu.memory_space<vmem>>) attributes {dimension_semantics = [#tpu.dimension_semantics<parallel>], iteration_bounds = array<i64: 2>, scalar_prefetch = 0 : i64, scratch_operands = 0 : i64, tpu.core_type = #tpu.core_type<tc>, window_params = [{transform_indices = @transform_0, window_bounds = array<i64: 4, 1024>}, {pipeline_mode = #tpu.pipeline_mode<synchronous>, transform_indices = @transform_1, window_bounds = array<i64: 32, 4>}, {pipeline_mode = #tpu.pipeline_mode<synchronous>, transform_indices = @transform_2, window_bounds = array<i64: 32, 1>}, {pipeline_mode = #tpu.pipeline_mode<synchronous>, transform_indices = @transform_3, window_bounds = array<i64: 32, 32>}, {pipeline_mode = #tpu.pipeline_mode<synchronous>, transform_indices = @transform_4, window_bounds = array<i64: 32, 1>}, {pipeline_mode = #tpu.pipeline_mode<synchronous>, transform_indices = @transform_5, window_bounds = array<i64: 1, 32>}, {pipeline_mode = #tpu.pipeline_mode<synchronous>, transform_indices = @transform_6, window_bounds = array<i64: 1, 1>}, {transform_indices = @transform_7, window_bounds = array<i64: 1, 1024>}]} {
    %c0 = arith.constant 0 : index
    %c0_0 = arith.constant 0 : index
    %0 = vector.load %arg2[%c0, %c0_0] : memref<32x4xf32, #tpu.memory_space<vmem>>, vector<32x4xf32>
    %c0_1 = arith.constant 0 : index
    %c0_2 = arith.constant 0 : index
    %1 = vector.load %arg1[%c0_1, %c0_2] : memref<4x1024xf32, #tpu.memory_space<vmem>>, vector<4x1024xf32>
    %cst = arith.constant dense<0.000000e+00> : vector<32x1024xf32>
    %2 = tpu.matmul %0, %1, %cst {dimension_numbers = #tpu.dot_dimension_numbers<[1], [0], [0], [1], [0, 0, 1, 1], [], []>} : vector<32x4xf32>, vector<4x1024xf32>, vector<32x1024xf32> -> vector<32x1024xf32>
    %c0_3 = arith.constant 0 : index
    %c0_4 = arith.constant 0 : index
    %3 = vector.load %arg3[%c0_3, %c0_4] : memref<32x1xf32, #tpu.memory_space<vmem>>, vector<32x1xf32>
    %4 = vector.broadcast %3 : vector<32x1xf32> to vector<32x1024xf32>
    %5 = arith.addf %2, %4 : vector<32x1024xf32>
    %cst_5 = arith.constant 0.000000e+00 : f32
    %6 = vector.broadcast %cst_5 : f32 to vector<32x1024xf32>
    %7 = arith.cmpf ogt, %5, %6 : vector<32x1024xf32>
    %cst_6 = arith.constant 2.000000e-01 : f32
    %8 = vector.broadcast %cst_6 : f32 to vector<32x1024xf32>
    %9 = arith.mulf %8, %5 : vector<32x1024xf32>
    %10 = arith.select %7, %5, %9 : vector<32x1024xi1>, vector<32x1024xf32>
    %c0_7 = arith.constant 0 : index
    %c0_8 = arith.constant 0 : index
    %11 = vector.load %arg4[%c0_7, %c0_8] : memref<32x32xf32, #tpu.memory_space<vmem>>, vector<32x32xf32>
    %cst_9 = arith.constant dense<0.000000e+00> : vector<32x1024xf32>
    %12 = tpu.matmul %11, %10, %cst_9 {dimension_numbers = #tpu.dot_dimension_numbers<[1], [0], [0], [1], [0, 0, 1, 1], [], []>} : vector<32x32xf32>, vector<32x1024xf32>, vector<32x1024xf32> -> vector<32x1024xf32>
    %c0_10 = arith.constant 0 : index
    %c0_11 = arith.constant 0 : index
    %13 = vector.load %arg5[%c0_10, %c0_11] : memref<32x1xf32, #tpu.memory_space<vmem>>, vector<32x1xf32>
    %14 = vector.broadcast %13 : vector<32x1xf32> to vector<32x1024xf32>
    %15 = arith.addf %12, %14 : vector<32x1024xf32>
    %cst_12 = arith.constant 0.000000e+00 : f32
    %16 = vector.broadcast %cst_12 : f32 to vector<32x1024xf32>
    %17 = arith.cmpf ogt, %15, %16 : vector<32x1024xf32>
    %cst_13 = arith.constant 2.000000e-01 : f32
    %18 = vector.broadcast %cst_13 : f32 to vector<32x1024xf32>
    %19 = arith.mulf %18, %15 : vector<32x1024xf32>
    %20 = arith.select %17, %15, %19 : vector<32x1024xi1>, vector<32x1024xf32>
    %c0_14 = arith.constant 0 : index
    %c0_15 = arith.constant 0 : index
    %21 = vector.load %arg6[%c0_14, %c0_15] : memref<1x32xf32, #tpu.memory_space<vmem>>, vector<1x32xf32>
    %cst_16 = arith.constant dense<0.000000e+00> : vector<1x1024xf32>
    %22 = tpu.matmul %21, %20, %cst_16 {dimension_numbers = #tpu.dot_dimension_numbers<[1], [0], [0], [1], [0, 0, 1, 1], [], []>} : vector<1x32xf32>, vector<32x1024xf32>, vector<1x1024xf32> -> vector<1x1024xf32>
    %c0_17 = arith.constant 0 : index
    %c0_18 = arith.constant 0 : index
    %23 = vector.load %arg7[%c0_17, %c0_18] : memref<1x1xf32, #tpu.memory_space<vmem>>, vector<1x1xf32>
    %24 = vector.broadcast %23 : vector<1x1xf32> to vector<1x1024xf32>
    %25 = arith.addf %22, %24 : vector<1x1024xf32>
    %26 = arith.negf %25 : vector<1x1024xf32>
    %27 = math.exp %26 : vector<1x1024xf32>
    %cst_19 = arith.constant 1.000000e+00 : f32
    %28 = vector.broadcast %cst_19 : f32 to vector<1x1024xf32>
    %29 = arith.addf %28, %27 : vector<1x1024xf32>
    %30 = arith.divf %28, %29 : vector<1x1024xf32>
    %c0_20 = arith.constant 0 : index
    %c0_21 = arith.constant 0 : index
    %31 = vector.load %arg8[%c0_20, %c0_21] : memref<1x1024xf32, #tpu.memory_space<vmem>>, vector<1x1024xf32>
    tpu.vector_store %arg8[%c0_20, %c0_21], %30 {strides = array<i32>} : memref<1x1024xf32, #tpu.memory_space<vmem>>, vector<1x1024xf32>,
    return
  }
  func.func @transform_0(%arg0: i32) -> (i32, i32) {
    %c0_i32 = arith.constant 0 : i32
    %c0_i32_0 = arith.constant 0 : i32
    return %c0_i32, %arg0 : i32, i32
  }
  func.func @transform_1(%arg0: i32) -> (i32, i32) {
    %c0_i32 = arith.constant 0 : i32
    %c0_i32_0 = arith.constant 0 : i32
    %c0_i32_1 = arith.constant 0 : i32
    return %c0_i32, %c0_i32_0 : i32, i32
  }
  func.func @transform_2(%arg0: i32) -> (i32, i32) {
    %c0_i32 = arith.constant 0 : i32
    %c0_i32_0 = arith.constant 0 : i32
    %c0_i32_1 = arith.constant 0 : i32
    return %c0_i32, %c0_i32_0 : i32, i32
  }
  func.func @transform_3(%arg0: i32) -> (i32, i32) {
    %c0_i32 = arith.constant 0 : i32
    %c0_i32_0 = arith.constant 0 : i32
    %c0_i32_1 = arith.constant 0 : i32
    return %c0_i32, %c0_i32_0 : i32, i32
  }
  func.func @transform_4(%arg0: i32) -> (i32, i32) {
    %c0_i32 = arith.constant 0 : i32
    %c0_i32_0 = arith.constant 0 : i32
    %c0_i32_1 = arith.constant 0 : i32
    return %c0_i32, %c0_i32_0 : i32, i32
  }
  func.func @transform_5(%arg0: i32) -> (i32, i32) {
    %c0_i32 = arith.constant 0 : i32
    %c0_i32_0 = arith.constant 0 : i32
    %c0_i32_1 = arith.constant 0 : i32
    return %c0_i32, %c0_i32_0 : i32, i32
  }
  func.func @transform_6(%arg0: i32) -> (i32, i32) {
    %c0_i32 = arith.constant 0 : i32
    %c0_i32_0 = arith.constant 0 : i32
    %c0_i32_1 = arith.constant 0 : i32
    return %c0_i32, %c0_i32_0 : i32, i32
  }
  func.func @transform_7(%arg0: i32) -> (i32, i32) {
    %c0_i32 = arith.constant 0 : i32
    %c0_i32_0 = arith.constant 0 : i32
    return %c0_i32, %arg0 : i32, i32
  }
}

</mosaic_0001>

<bundles_post_ra>
// kernel: tpu_custom_call.1
= control target key start
LH: loop header
LB: loop body
LE: loop exit
PB: predicated region body
PF: predicated region fallthrough
CT: control target
= control target key end

     0   :  { %s2353_s0 = inlined_call_operand.vmem [shape: f32[4,2048], index: 0, kind: input, shape index: {}]   ;;  %s2354_s1 = inlined_call_operand.vmem [shape: f32[32,4], index: 1, kind: input, shape index: {}]   ;;  %s2355_s2 = inlined_call_operand.vmem [shape: f32[32,1], index: 2, kind: input, shape index: {}]   ;;  %s2356_s3 = inlined_call_operand.vmem [shape: f32[32,32], index: 3, kind: input, shape index: {}]   ;;  %s2357_s4 = inlined_call_operand.vmem [shape: f32[32,1], index: 4, kind: input, shape index: {}]   ;;  %s2358_s5 = inlined_call_operand.vmem [shape: f32[1,32], index: 5, kind: input, shape index: {}]   ;;  %s2359_s6 = inlined_call_operand.<no memory space> [shape: f32[1,1], index: 6, kind: input, shape index: {}]   ;;  %s2360_s7 = inlined_call_operand.hbm [shape: f32[1,2048], index: 7, kind: output, shape index: {}]  }
   0x1   :  { %v12_v0 = vstv %s2359_s6 }
   0x2   :  { %13 = vst [vmem:[#allocation2] sm:$0x1] %v12_v0 }
   0x3   :  { %14 = vsyncpa [#allocation4], 0 }
   0x4   :  { %16 = vsyncpa [#allocation4 + $0x1], 0  ;;  %s1770_s26 = smov 0   ;;  %s1772_s27 = smov 0  }
   0x5   :  { %s1774_s28 = smov 0   ;;  %s1776_s29 = smov 0  }
   0x6 LB: > { %s1487_s6 = sadd.s32 4294967295, %s1724_s29   ;;  %s1488_s30 = sadd.s32 4294967294, %s1724_s29   ;;  %s1724_s29 = sphi %s1776_s29, %s2386_s29   ;;  %s1720_s28 = sphi %s1774_s28, %s2385_s28   ;;  %s1716_s27 = sphi %s1772_s27, %s2384_s27   ;;  %s1712_s26 = sphi %s1770_s26, %s2383_s26  }
   0x7   : > { %s1793_s8 = sadd.s32 1, %s1724_s29   ;;  %s181_s9 = sadd.s32 1, %s1720_s28 }
   0x8   : > { %s178_s10 = ssub.s32 %s1724_s29, %s1793_s8  ;;  %p191_p0 = scmp.ne.s32.totalorder %s1720_s28, %s1716_s27 }
   0x9   : > { %p179_p1 = scmp.eq.s32.totalorder %s178_s10, 0  ;;  %p192_p2 = scmp.eq.s32.totalorder %s1487_s6, 1 }
   0xa   : > { %p197_p3 = scmp.ne.s32.totalorder %s1716_s27, %s1712_s26  ;;  %p198_p4 = scmp.eq.s32.totalorder %s1488_s30, 1 }
   0xb   : > { %s1803_s11 = scalar_select %p179_p1, %s1720_s28, %s181_s9  }
   0xc   : > { %p1805_p5 = por %p192_p2, %p191_p0  ;;  %p1809_p6 = por %p198_p4, %p197_p3 }
   0xd   : > { %p1491_p7 = scmp.ge.s32.totalorder %s1724_s29, 1  ;;  %p243_p8 = scmp.lt.s32.totalorder %s1724_s29, 3 }
   0xf   : > { %p244_p9 = pnand %p1491_p7, %p243_p8 }
  0x10   : > { %s1815_s14 = sshll.u32 (!%p244_p9), %s1487_s6, 3  ;;  %s272_s24 = sand.u32 (!%p244_p9), 1, %s1716_s27  }
  0x11   : > { %247 = sbr.rel (%p244_p9) target bundleno = 578 (0x242), region = 48  ;;  %p276_p10 = scmp.lt.s32.totalorder (!%p244_p9), %s1815_s14, 15 }
  0x12   : > { %s2302_s25 = sshll.u32 (!%p244_p9), %s272_s24, 3  ;;  %s1424_s9 = scalar_lea.hbm (!%p244_p9), %s2360_s7, %s1815_s14 }
  0x13   : > { %s274_s10 = scalar_lea.vmem (!%p244_p9), [#allocation3], %s2302_s25  ;;  %s1428_s16 = sshll.u32 (!%p244_p9), %s1424_s9, 4  ;;  %s1429_s16 = int_to_ptr.hbm [resolvable:$true] %s1428_s16 }
  0x14   : > { %s1426_s15 = sshll.u32 (!%p244_p9), %s274_s10, 4  ;;  %s1682_s21 = scalar_lea.hbm (!%p244_p9), %s2360_s7, 16  ;;  %s1427_s15 = int_to_ptr.vmem [resolvable:$true] %s1426_s15 }
  0x16   : > { %v1726_v1 = vmov 0   ;;  %v291_v2 = vld [vmem:[%s2355_s2 + $0x8] sm:$0xff]  ;;  %s277_s17 = scalar_select %p276_p10, %s1815_s14, 15  ;;  %v293_v3 = vld [vmem:[%s2355_s2 + $0x18] sm:$0xff]  ;;  %v290_v6 = vld [vmem:[%s2355_s2] sm:$0xff]  ;;  %vm346_vm0 = vcmask 1043456  }
  0x17   : > { %1628 = vset.pattern.permute.xlu1 %v1726_v1  ;;  %1627 = vset.pattern.permute.xlu0 %v1726_v1  ;;  %v292_v9 = vld [vmem:[%s2355_s2 + $0x10] sm:$0xff]  ;;  %v282_v10 = vld [vmem:[%s2354_s1] sm:$0xff]  ;;  %vm333_vm1 = vcmask 31744   ;;  %v696_v19 = vld [vmem:[%s2357_s4 + $0x8] sm:$0xff]  ;;  %vm719_vm12 = vcmask 261120   ;;  %s1414_s14 = scalar_lea.sflag [#allocation4], %s272_s24 }
  0x18   : > { %301 = vperm.xlu1 %1628, %v291_v2   ;;  %1629 = vset.pattern.permute.xlu2 %v1726_v1  ;;  %s1494_s18 = sshll.u32 %s277_s17, 2  ;;  %v283_v20 = vld [vmem:[%s2354_s1 + $0x8] sm:$0xff]  ;;  %v695_v21 = vld [vmem:[%s2357_s4] sm:$0xff]  ;;  %v284_v22 = vld [vmem:[%s2354_s1 + $0x10] sm:$0xff]  ;;  %s1676_s17 = sshra.s32 %s1429_s16, 4  ;;  %s1677_s17 = int_to_ptr.hbm [resolvable:$true] %s1676_s17 }
  0x19   : > { %s279_s23 = scalar_lea.vmem %s2353_s0, %s1494_s18  ;;  %311 = vperm.xlu0 %1627, %v293_v3   ;;  %v285_v23 = vld [vmem:[%s2354_s1 + $0x18] sm:$0xff]  ;;  %s1678_s18 = scalar_lea.hbm %s1677_s17, 8 }
  0x1a   : > { %v286_v4 = vld [vmem:[%s279_s23] sm:$0xff]  ;;  %v287_v5 = vld [vmem:[%s279_s23 + $0x8] sm:$0xff]  ;;  %v289_v7 = vld [vmem:[%s279_s23 + $0x18] sm:$0xff]  ;;  %p1679_p11 = scmp.ne.s32.totalorder %s1677_s17, %s1678_s18  ;;  %p1683_p0 = scmp.lt.s32.totalorder %s1677_s17, %s2360_s7 }
  0x1b   : > { %318 = vst [vmem:[#allocation1] ss:$2 sm:$0xff] %v286_v4  ;;  %v288_v8 = vld [vmem:[%s279_s23 + $0x10] sm:$0xff]  ;;  %p1684_p1 = scmp.lt.s32.totalorder %s1682_s21, %s1678_s18 }
  0x1c   : > { %320 = vst [vmem:[#allocation1 + $0x10] ss:$2 sm:$0xff] %v287_v5  ;;  %p1680_p12 = pnand %p1679_p11, %p1805_p5 }
  0x1d   : > { %324 = vst [vmem:[#allocation1 + $0x30] ss:$2 sm:$0xff] %v289_v7  ;;  %p1685_p2 = por %p1684_p1, %p1683_p0 }
  0x1e   : > { %322 = vst [vmem:[#allocation1 + $0x20] ss:$2 sm:$0xff] %v288_v8  ;;  %p1681_p13 = pneg %p1680_p12 }
  0x20   : > { %296 = vperm.xlu1 %1628, %v290_v6   ;;  %p1686_p3 = pnand %p1685_p2, %p1681_p13 }
  0x21   : > { %306 = vperm.xlu0 %1627, %v292_v9  }
  0x22   : > { %v325_v11 = vld.sshfl [vmem:[#allocation1] sm:$0xff pattern:$0x75316420]  ;;  %v326_v12 = vld.sshfl [vmem:[#allocation1 + $0x8] sm:$0xff pattern:$0x75316420] }
  0x23   : > { %1495 = vmatpush.msk.msra.mxu0 %vm346_vm0, %v325_v11  ;;  %1500 = vmatpush.msk.msra.mxu1 %vm346_vm0, %v326_v12  ;;  %v327_v13 = vld.sshfl [vmem:[#allocation1 + $0x10] sm:$0xff pattern:$0x75316420]  ;;  %v328_v14 = vld.sshfl [vmem:[#allocation1 + $0x18] sm:$0xff pattern:$0x75316420] }
  0x24   : > { %1505 = vmatpush.msk.msra.mxu2 %vm346_vm0, %v327_v13  ;;  %1510 = vmatpush.msk.msra.mxu3 %vm346_vm0, %v328_v14  ;;  %v331_v15 = vld.sshfl [vmem:[#allocation1 + $0x30] sm:$0xff pattern:$0x75316420]  ;;  %v332_v16 = vld.sshfl [vmem:[#allocation1 + $0x38] sm:$0xff pattern:$0x75316420] }
  0x25   : > { %1496 = vmatmul.msk.f32.vlgmr.msra.gmra.mxu0 %vm333_vm1, %v282_v10  ;;  %1501 = vmatmul.msk.f32.vlgmr.msra.gmra.mxu1 %vm333_vm1, %v282_v10  ;;  %v329_v17 = vld.sshfl [vmem:[#allocation1 + $0x20] sm:$0xff pattern:$0x75316420]  ;;  %v330_v18 = vld.sshfl [vmem:[#allocation1 + $0x28] sm:$0xff pattern:$0x75316420] }
  0x26   : > { %1506 = vmatmul.msk.f32.vlgmr.msra.gmra.mxu2 %vm333_vm1, %v282_v10  ;;  %1511 = vmatmul.msk.f32.vlgmr.msra.gmra.mxu3 %vm333_vm1, %v282_v10 }
  0x27   : > { %1525 = vmatpush.msk.msrb.mxu2 %vm346_vm0, %v331_v15  ;;  %1530 = vmatpush.msk.msrb.mxu3 %vm346_vm0, %v332_v16 }
  0x28   : > { %1515 = vmatpush.msk.msrb.mxu0 %vm346_vm0, %v329_v17  ;;  %1520 = vmatpush.msk.msrb.mxu1 %vm346_vm0, %v330_v18  ;;  %v1930_v18 = vld [vmem:[%s2356_s3] sm:$0xff] }
  0x29   : > { %706 = vperm.xlu0 %1627, %v696_v19   ;;  %701 = vperm.xlu1 %1628, %v695_v21  }
  0x2d   : > { %1497 = vmatmul.msk.f32.gmra.mxu0 %vm333_vm1, %v283_v20  ;;  %1502 = vmatmul.msk.f32.gmra.mxu1 %vm333_vm1, %v283_v20 }
  0x2e   : > { %1507 = vmatmul.msk.f32.gmra.mxu2 %vm333_vm1, %v283_v20  ;;  %1512 = vmatmul.msk.f32.gmra.mxu3 %vm333_vm1, %v283_v20 }
  0x35   : > { %1498 = vmatmul.msk.f32.gmra.mxu0 %vm333_vm1, %v284_v22  ;;  %1503 = vmatmul.msk.f32.gmra.mxu1 %vm333_vm1, %v284_v22 }
  0x36   : > { %1508 = vmatmul.msk.f32.gmra.mxu2 %vm333_vm1, %v284_v22  ;;  %1513 = vmatmul.msk.f32.gmra.mxu3 %vm333_vm1, %v284_v22 }
  0x3d   : > { %1499 = vmatmul.msk.f32.gmra.mxu0 %vm333_vm1, %v285_v23  ;;  %1504 = vmatmul.msk.f32.gmra.mxu1 %vm333_vm1, %v285_v23 }
  0x3e   : > { %1509 = vmatmul.msk.f32.gmra.mxu2 %vm333_vm1, %v285_v23  ;;  %1514 = vmatmul.msk.f32.gmra.mxu3 %vm333_vm1, %v285_v23 }
  0x45   : > { %1516 = vmatmul.msk.f32.vlgmr.msrb.gmra.mxu0 %vm333_vm1, %v282_v10  ;;  %1521 = vmatmul.msk.f32.vlgmr.msrb.gmra.mxu1 %vm333_vm1, %v282_v10 }
  0x46   : > { %1526 = vmatmul.msk.f32.vlgmr.msrb.gmra.mxu2 %vm333_vm1, %v282_v10  ;;  %1531 = vmatmul.msk.f32.vlgmr.msrb.gmra.mxu3 %vm333_vm1, %v282_v10 }
  0x4d   : > { %1517 = vmatmul.msk.f32.gmra.mxu0 %vm333_vm1, %v283_v20  ;;  %1522 = vmatmul.msk.f32.gmra.mxu1 %vm333_vm1, %v283_v20 }
  0x4e   : > { %1527 = vmatmul.msk.f32.gmra.mxu2 %vm333_vm1, %v283_v20  ;;  %1532 = vmatmul.msk.f32.gmra.mxu3 %vm333_vm1, %v283_v20 }
  0x55   : > { %1518 = vmatmul.msk.f32.gmra.mxu0 %vm333_vm1, %v284_v22  ;;  %1523 = vmatmul.msk.f32.gmra.mxu1 %vm333_vm1, %v284_v22 }
  0x56   : > { %1528 = vmatmul.msk.f32.gmra.mxu2 %vm333_vm1, %v284_v22  ;;  %1533 = vmatmul.msk.f32.gmra.mxu3 %vm333_vm1, %v284_v22 }
  0x5d   : > { %1519 = vmatmul.msk.f32.gmra.mxu0 %vm333_vm1, %v285_v23  ;;  %1524 = vmatmul.msk.f32.gmra.mxu1 %vm333_vm1, %v285_v23 }
  0x5e   : > { %1529 = vmatmul.msk.f32.gmra.mxu2 %vm333_vm1, %v285_v23  ;;  %1534 = vmatmul.msk.f32.gmra.mxu3 %vm333_vm1, %v285_v23 }
  0x8a   : > { %v1892_v30 = vpop.permute.xlu1 %301 }
  0x8b   : > { %v1894_v31 = vpop.permute.xlu0 %311 }
  0x92   : > { %v1896_v36 = vpop.permute.xlu1 %296 }
  0x93   : > { %v1898_v37 = vpop.permute.xlu0 %306 }
  0xa2   : > { %v380_v24 = vpop.f32.mrf.mxu0  ;;  %v409_v25 = vpop.f32.mrf.mxu1 }
  0xa3   : > { %v381_v38 = vadd.f32 %v380_v24, %v1896_v36  ;;  %v410_v41 = vadd.f32 %v409_v25, %v1896_v36 }
  0xa5   : > { %vm595_vm2 = vcmp.gt.f32.partialorder %v381_v38, 0.0  ;;  %v627_v50 = vmul.f32 0.2, %v381_v38  ;;  %v628_v53 = vmul.f32 0.2, %v410_v41  ;;  %vm596_vm9 = vcmp.gt.f32.partialorder %v410_v41, 0.0 }
  0xa7   : > { %v659_v63 = vsel %vm595_vm2, %v381_v38, %v627_v50  ;;  %v660_v17 = vsel %vm596_vm9, %v410_v41, %v628_v53 }
  0xa9   : > { %v438_v26 = vpop.f32.mrf.mxu2  ;;  %v467_v27 = vpop.f32.mrf.mxu3 }
  0xaa   : > { %v383_v28 = vpop.f32.mrf.mxu0  ;;  %v412_v29 = vpop.f32.mrf.mxu1  ;;  %v1911_v62 = vadd.f32 %v438_v26, %v1896_v36  ;;  %v468_v0 = vadd.f32 %v467_v27, %v1896_v36 }
  0xab   : > { %v384_v44 = vadd.f32 %v383_v28, %v1892_v30  ;;  %v413_v45 = vadd.f32 %v412_v29, %v1892_v30 }
  0xac   : > { %v629_v23 = vmul.f32 0.2, %v1911_v62  ;;  %v630_v24 = vmul.f32 0.2, %v468_v0  ;;  %vm597_vm2 = vcmp.gt.f32.partialorder %v1911_v62, 0.0 }
  0xad   : > { %v635_v56 = vmul.f32 0.2, %v384_v44  ;;  %v636_v57 = vmul.f32 0.2, %v413_v45  ;;  %vm603_vm7 = vcmp.gt.f32.partialorder %v384_v44, 0.0  ;;  %vm604_vm8 = vcmp.gt.f32.partialorder %v413_v45, 0.0 }
  0xaf   : > { %v667_v13 = vsel %vm603_vm7, %v384_v44, %v635_v56  ;;  %v668_v14 = vsel %vm604_vm8, %v413_v45, %v636_v57  ;;  %v1963_v44 = vld [vmem:[%s2356_s3 + $0x10] sm:$0xff] }
  0xb1   : > { %v441_v32 = vpop.f32.mrf.mxu2  ;;  %v470_v33 = vpop.f32.mrf.mxu3 }
  0xb2   : > { %v386_v34 = vpop.f32.mrf.mxu0  ;;  %v415_v35 = vpop.f32.mrf.mxu1  ;;  %v442_v1 = vadd.f32 %v441_v32, %v1892_v30  ;;  %v471_v6 = vadd.f32 %v470_v33, %v1892_v30 }
  0xb3   : > { %v387_v39 = vadd.f32 %v386_v34, %v1898_v37  ;;  %v416_v40 = vadd.f32 %v415_v35, %v1898_v37  ;;  %v661_v35 = vsel %vm597_vm2, %v1911_v62, %v629_v23 }
  0xb4   : > { %v637_v19 = vmul.f32 0.2, %v442_v1  ;;  %v638_v20 = vmul.f32 0.2, %v471_v6  ;;  %vm605_vm15 = vcmp.gt.f32.partialorder %v442_v1, 0.0  ;;  %vm606_vm1 = vcmp.gt.f32.partialorder %v471_v6, 0.0 }
  0xb5   : > { %v643_v51 = vmul.f32 0.2, %v387_v39  ;;  %v644_v52 = vmul.f32 0.2, %v416_v40  ;;  %vm611_vm5 = vcmp.gt.f32.partialorder %v387_v39, 0.0  ;;  %vm612_vm6 = vcmp.gt.f32.partialorder %v416_v40, 0.0 }
  0xb6   : > { %v669_v33 = vsel %vm605_vm15, %v442_v1, %v637_v19  ;;  %v670_v34 = vsel %vm606_vm1, %v471_v6, %v638_v20 }
  0xb7   : > { %v675_v4 = vsel %vm611_vm5, %v387_v39, %v643_v51  ;;  %v676_v5 = vsel %vm612_vm6, %v416_v40, %v644_v52  ;;  %v1950_v39 = vld [vmem:[%s2356_s3 + $0x8] sm:$0xff]  ;;  %v698_v51 = vld [vmem:[%s2357_s4 + $0x18] sm:$0xff] }
  0xb8   : > { %716 = vperm.xlu2 %1629, %v698_v51  }
  0xb9   : > { %v444_v42 = vpop.f32.mrf.mxu2  ;;  %v473_v43 = vpop.f32.mrf.mxu3 }
  0xba   : > { %v389_v46 = vpop.f32.mrf.mxu0  ;;  %v418_v47 = vpop.f32.mrf.mxu1  ;;  %v445_v58 = vadd.f32 %v444_v42, %v1898_v37  ;;  %v474_v59 = vadd.f32 %v473_v43, %v1898_v37 }
  0xbb   : > { %v390_v48 = vadd.f32 %v389_v46, %v1894_v31  ;;  %v419_v49 = vadd.f32 %v418_v47, %v1894_v31 }
  0xbc   : > { %v645_v11 = vmul.f32 0.2, %v445_v58  ;;  %v646_v12 = vmul.f32 0.2, %v474_v59  ;;  %vm613_vm13 = vcmp.gt.f32.partialorder %v445_v58, 0.0  ;;  %vm614_vm14 = vcmp.gt.f32.partialorder %v474_v59, 0.0 }
  0xbd   : > { %vm619_vm3 = vcmp.gt.f32.partialorder %v390_v48, 0.0  ;;  %v651_v54 = vmul.f32 0.2, %v390_v48  ;;  %vm620_vm4 = vcmp.gt.f32.partialorder %v419_v49, 0.0  ;;  %v652_v55 = vmul.f32 0.2, %v419_v49 }
  0xbe   : > { %v677_v25 = vsel %vm613_vm13, %v445_v58, %v645_v11  ;;  %v678_v26 = vsel %vm614_vm14, %v474_v59, %v646_v12  ;;  %v697_v12 = vld [vmem:[%s2357_s4 + $0x10] sm:$0xff] }
  0xbf   : > { %v683_v60 = vsel %vm619_vm3, %v390_v48, %v651_v54  ;;  %v684_v61 = vsel %vm620_vm4, %v419_v49, %v652_v55  ;;  %vm598_vm3 = vcmp.gt.f32.partialorder %v468_v0, 0.0 }
  0xc0   : > { %744 = vmatpush.msra.mxu0 %v683_v60  ;;  %773 = vmatpush.msra.mxu1 %v684_v61  ;;  %v662_v38 = vsel %vm598_vm3, %v468_v0, %v630_v24  ;;  %v1989_v60 = vld [vmem:[%s2356_s3 + $0x18] sm:$0xff] }
  0xc1   : > { %v447_v2 = vpop.f32.mrf.mxu2  ;;  %v476_v3 = vpop.f32.mrf.mxu3  ;;  %711 = vperm.xlu2 %1629, %v697_v12  }
  0xc2   : > { %v448_v7 = vadd.f32 %v447_v2, %v1894_v31  ;;  %v477_v8 = vadd.f32 %v476_v3, %v1894_v31  ;;  %v1921_v9 = vpop.f32.mrf.mxu0  ;;  %v1923_v10 = vpop.f32.mrf.mxu1  ;;  %745 = vmatpush.msra.mxu0 %v675_v4  ;;  %774 = vmatpush.msra.mxu1 %v676_v5 }
  0xc3   : > { %v497_v45 = vadd.f32 %v1921_v9, %v1896_v36  ;;  %v526_v46 = vadd.f32 %v1923_v10, %v1896_v36 }
  0xc4   : > { %vm621_vm10 = vcmp.gt.f32.partialorder %v448_v7, 0.0  ;;  %v653_v15 = vmul.f32 0.2, %v448_v7  ;;  %vm622_vm11 = vcmp.gt.f32.partialorder %v477_v8, 0.0  ;;  %v654_v16 = vmul.f32 0.2, %v477_v8  ;;  %746 = vmatpush.msra.mxu0 %v667_v13  ;;  %775 = vmatpush.msra.mxu1 %v668_v14 }
  0xc5   : > { %v631_v56 = vmul.f32 0.2, %v497_v45  ;;  %v632_v57 = vmul.f32 0.2, %v526_v46  ;;  %vm599_vm4 = vcmp.gt.f32.partialorder %v497_v45, 0.0  ;;  %vm600_vm5 = vcmp.gt.f32.partialorder %v526_v46, 0.0 }
  0xc6   : > { %747 = vmatpush.msra.mxu0 %v659_v63  ;;  %776 = vmatpush.msra.mxu1 %v660_v17  ;;  %v685_v21 = vsel %vm621_vm10, %v448_v7, %v653_v15  ;;  %v686_v22 = vsel %vm622_vm11, %v477_v8, %v654_v16 }
  0xc7   : > { %802 = vmatpush.msra.mxu2 %v685_v21  ;;  %831 = vmatpush.msra.mxu3 %v686_v22  ;;  %v663_v5 = vsel %vm599_vm4, %v497_v45, %v631_v56  ;;  %v664_v6 = vsel %vm600_vm5, %v526_v46, %v632_v57 }
  0xc8   : > { %1535 = vmatmul.msk.f32.vlgmr.msra.gmra.mxu0 %vm719_vm12, %v1930_v18  ;;  %1539 = vmatmul.msk.f32.vlgmr.msra.gmra.mxu1 %vm719_vm12, %v1930_v18 }
  0xc9   : > { %v1939_v27 = vpop.f32.mrf.mxu2  ;;  %v1941_v28 = vpop.f32.mrf.mxu3  ;;  %803 = vmatpush.msra.mxu2 %v677_v25  ;;  %832 = vmatpush.msra.mxu3 %v678_v26 }
  0xca   : > { %v499_v29 = vpop.f32.mrf.mxu0  ;;  %v528_v32 = vpop.f32.mrf.mxu1  ;;  %v584_v22 = vadd.f32 %v1941_v28, %v1896_v36 }
  0xcb   : > { %804 = vmatpush.msra.mxu2 %v669_v33  ;;  %833 = vmatpush.msra.mxu3 %v670_v34  ;;  %v500_v47 = vadd.f32 %v499_v29, %v1892_v30  ;;  %v529_v48 = vadd.f32 %v528_v32, %v1892_v30 }
  0xcc   : > { %v634_v28 = vmul.f32 0.2, %v584_v22  ;;  %vm602_vm5 = vcmp.gt.f32.partialorder %v584_v22, 0.0 }
  0xcd   : > { %805 = vmatpush.msra.mxu2 %v661_v35  ;;  %834 = vmatpush.msra.mxu3 %v662_v38  ;;  %v639_v61 = vmul.f32 0.2, %v500_v47  ;;  %v640_v62 = vmul.f32 0.2, %v529_v48  ;;  %vm607_vm8 = vcmp.gt.f32.partialorder %v500_v47, 0.0  ;;  %vm608_vm11 = vcmp.gt.f32.partialorder %v529_v48, 0.0 }
  0xce   : > { %1543 = vmatmul.msk.f32.vlgmr.msra.gmra.mxu2 %vm719_vm12, %v1930_v18  ;;  %1547 = vmatmul.msk.f32.vlgmr.msra.gmra.mxu3 %vm719_vm12, %v1930_v18 }
  0xcf   : > { %v671_v11 = vsel %vm607_vm8, %v500_v47, %v639_v61  ;;  %v672_v19 = vsel %vm608_vm11, %v529_v48, %v640_v62 }
  0xd0   : > { %1536 = vmatmul.msk.f32.gmra.mxu0 %vm719_vm12, %v1950_v39  ;;  %1540 = vmatmul.msk.f32.gmra.mxu1 %vm719_vm12, %v1950_v39 }
  0xd1   : > { %v557_v40 = vpop.f32.mrf.mxu2  ;;  %v586_v41 = vpop.f32.mrf.mxu3 }
  0xd2   : > { %v502_v42 = vpop.f32.mrf.mxu0  ;;  %v531_v43 = vpop.f32.mrf.mxu1  ;;  %v587_v17 = vadd.f32 %v586_v41, %v1892_v30 }
  0xd3   : > { %v503_v52 = vadd.f32 %v502_v42, %v1898_v37  ;;  %v532_v53 = vadd.f32 %v531_v43, %v1898_v37 }
  0xd4   : > { %v642_v29 = vmul.f32 0.2, %v587_v17  ;;  %vm610_vm3 = vcmp.gt.f32.partialorder %v587_v17, 0.0 }
  0xd5   : > { %v647_v1 = vmul.f32 0.2, %v503_v52  ;;  %v648_v2 = vmul.f32 0.2, %v532_v53  ;;  %vm615_vm9 = vcmp.gt.f32.partialorder %v503_v52, 0.0  ;;  %vm616_vm10 = vcmp.gt.f32.partialorder %v532_v53, 0.0 }
  0xd6   : > { %1544 = vmatmul.msk.f32.gmra.mxu2 %vm719_vm12, %v1950_v39  ;;  %1548 = vmatmul.msk.f32.gmra.mxu3 %vm719_vm12, %v1950_v39  ;;  %v674_v35 = vsel %vm610_vm3, %v587_v17, %v642_v29 }
  0xd7   : > { %v679_v15 = vsel %vm615_vm9, %v503_v52, %v647_v1  ;;  %v680_v16 = vsel %vm616_vm10, %v532_v53, %v648_v2  ;;  %v2064_v53 = vpop.permute.xlu0 %706 }
  0xd8   : > { %1537 = vmatmul.msk.f32.gmra.mxu0 %vm719_vm12, %v1963_v44  ;;  %1541 = vmatmul.msk.f32.gmra.mxu1 %vm719_vm12, %v1963_v44 }
  0xd9   : > { %v560_v49 = vpop.f32.mrf.mxu2  ;;  %v589_v50 = vpop.f32.mrf.mxu3 }
  0xda   : > { %v505_v54 = vpop.f32.mrf.mxu0  ;;  %v534_v55 = vpop.f32.mrf.mxu1  ;;  %v561_v7 = vadd.f32 %v560_v49, %v1898_v37  ;;  %v590_v8 = vadd.f32 %v589_v50, %v1898_v37  ;;  %v558_v37 = vadd.f32 %v557_v40, %v1892_v30  ;;  %v666_v40 = vsel %vm602_vm5, %v584_v22, %v634_v28 }
  0xdb   : > { %v506_v58 = vadd.f32 %v505_v54, %v1894_v31  ;;  %v535_v59 = vadd.f32 %v534_v55, %v1894_v31 }
  0xdc   : > { %v649_v23 = vmul.f32 0.2, %v561_v7  ;;  %v650_v24 = vmul.f32 0.2, %v590_v8  ;;  %vm617_vm15 = vcmp.gt.f32.partialorder %v561_v7, 0.0  ;;  %vm618_vm1 = vcmp.gt.f32.partialorder %v590_v8, 0.0 }
  0xdd   : > { %vm623_vm6 = vcmp.gt.f32.partialorder %v506_v58, 0.0  ;;  %v655_v63 = vmul.f32 0.2, %v506_v58  ;;  %vm624_vm7 = vcmp.gt.f32.partialorder %v535_v59, 0.0  ;;  %v656_v0 = vmul.f32 0.2, %v535_v59 }
  0xde   : > { %1545 = vmatmul.msk.f32.gmra.mxu2 %vm719_vm12, %v1963_v44  ;;  %1549 = vmatmul.msk.f32.gmra.mxu3 %vm719_vm12, %v1963_v44  ;;  %v641_v26 = vmul.f32 0.2, %v558_v37  ;;  %vm609_vm2 = vcmp.gt.f32.partialorder %v558_v37, 0.0  ;;  %v681_v32 = vsel %vm617_vm15, %v561_v7, %v649_v23  ;;  %v682_v33 = vsel %vm618_vm1, %v590_v8, %v650_v24 }
  0xdf   : > { %v687_v3 = vsel %vm623_vm6, %v506_v58, %v655_v63  ;;  %v688_v4 = vsel %vm624_vm7, %v535_v59, %v656_v0  ;;  %v2068_v58 = vpop.permute.xlu1 %701 }
  0xe0   : > { %1538 = vmatmul.msk.f32.gmra.mxu0 %vm719_vm12, %v1989_v60  ;;  %1542 = vmatmul.msk.f32.gmra.mxu1 %vm719_vm12, %v1989_v60  ;;  %v673_v34 = vsel %vm609_vm2, %v558_v37, %v641_v26 }
  0xe1   : > { %v563_v9 = vpop.f32.mrf.mxu2  ;;  %v592_v10 = vpop.f32.mrf.mxu3  ;;  %860 = vmatpush.msrb.mxu0 %v687_v3  ;;  %889 = vmatpush.msrb.mxu1 %v688_v4 }
  0xe2   : > { %v564_v13 = vadd.f32 %v563_v9, %v1894_v31  ;;  %v593_v14 = vadd.f32 %v592_v10, %v1894_v31  ;;  %v555_v31 = vadd.f32 %v1939_v27, %v1896_v36  ;;  %v1061_v36 = vld [vmem:[#allocation2] sm:$0x1] }
  0xe3   : > { %861 = vmatpush.msrb.mxu0 %v679_v15  ;;  %890 = vmatpush.msrb.mxu1 %v680_v16 }
  0xe4   : > { %vm625_vm13 = vcmp.gt.f32.partialorder %v564_v13, 0.0  ;;  %v657_v20 = vmul.f32 0.2, %v564_v13  ;;  %vm626_vm14 = vcmp.gt.f32.partialorder %v593_v14, 0.0  ;;  %v658_v21 = vmul.f32 0.2, %v593_v14  ;;  %1064 = vperm.xlu2 %1629, %v1061_v36  }
  0xe5   : > { %862 = vmatpush.msrb.mxu0 %v671_v11  ;;  %891 = vmatpush.msrb.mxu1 %v672_v19  ;;  %v633_v27 = vmul.f32 0.2, %v555_v31  ;;  %vm601_vm4 = vcmp.gt.f32.partialorder %v555_v31, 0.0  ;;  %v2083_v19 = vld [vmem:[%s2358_s5] sm:$0x1] }
  0xe6   : > { %1546 = vmatmul.msk.f32.gmra.mxu2 %vm719_vm12, %v1989_v60  ;;  %1550 = vmatmul.msk.f32.gmra.mxu3 %vm719_vm12, %v1989_v60  ;;  %v689_v30 = vsel %vm625_vm13, %v564_v13, %v657_v20  ;;  %v690_v25 = vsel %vm626_vm14, %v593_v14, %v658_v21 }
  0xe7   : > { %863 = vmatpush.msrb.mxu0 %v663_v5  ;;  %892 = vmatpush.msrb.mxu1 %v664_v6  ;;  %v665_v38 = vsel %vm601_vm4, %v555_v31, %v633_v27 }
  0xe8   : > { %918 = vmatpush.msrb.mxu2 %v689_v30  ;;  %947 = vmatpush.msrb.mxu3 %v690_v25 }
  0xe9   : > { %1551 = vmatmul.msk.f32.vlgmr.msrb.gmra.mxu0 %vm719_vm12, %v1930_v18  ;;  %1555 = vmatmul.msk.f32.vlgmr.msrb.gmra.mxu1 %vm719_vm12, %v1930_v18 }
  0xea   : > { %919 = vmatpush.msrb.mxu2 %v681_v32  ;;  %948 = vmatpush.msrb.mxu3 %v682_v33 }
  0xec   : > { %920 = vmatpush.msrb.mxu2 %v673_v34  ;;  %949 = vmatpush.msrb.mxu3 %v674_v35 }
  0xee   : > { %921 = vmatpush.msrb.mxu2 %v665_v38  ;;  %950 = vmatpush.msrb.mxu3 %v666_v40 }
  0xef   : > { %1559 = vmatmul.msk.f32.vlgmr.msrb.gmra.mxu2 %vm719_vm12, %v1930_v18  ;;  %1563 = vmatmul.msk.f32.vlgmr.msrb.gmra.mxu3 %vm719_vm12, %v1930_v18 }
  0xf1   : > { %1552 = vmatmul.msk.f32.gmra.mxu0 %vm719_vm12, %v1950_v39  ;;  %1556 = vmatmul.msk.f32.gmra.mxu1 %vm719_vm12, %v1950_v39 }
  0xf7   : > { %1560 = vmatmul.msk.f32.gmra.mxu2 %vm719_vm12, %v1950_v39  ;;  %1564 = vmatmul.msk.f32.gmra.mxu3 %vm719_vm12, %v1950_v39 }
  0xf9   : > { %1553 = vmatmul.msk.f32.gmra.mxu0 %vm719_vm12, %v1963_v44  ;;  %1557 = vmatmul.msk.f32.gmra.mxu1 %vm719_vm12, %v1963_v44 }
  0xff   : > { %1561 = vmatmul.msk.f32.gmra.mxu2 %vm719_vm12, %v1963_v44  ;;  %1565 = vmatmul.msk.f32.gmra.mxu3 %vm719_vm12, %v1963_v44 }
 0x101   : > { %1554 = vmatmul.msk.f32.gmra.mxu0 %vm719_vm12, %v1989_v60  ;;  %1558 = vmatmul.msk.f32.gmra.mxu1 %vm719_vm12, %v1989_v60 }
 0x107   : > { %1562 = vmatmul.msk.f32.gmra.mxu2 %vm719_vm12, %v1989_v60  ;;  %1566 = vmatmul.msk.f32.gmra.mxu3 %vm719_vm12, %v1989_v60 }
 0x112   : > { %v2054_v41 = vpop.permute.xlu2 %716 }
 0x11b   : > { %v2060_v48 = vpop.permute.xlu2 %711 }
 0x145   : > { %v749_v18 = vpop.f32.mrf.mxu0  ;;  %v778_v39 = vpop.f32.mrf.mxu1 }
 0x146   : > { %v750_v63 = vadd.f32 %v749_v18, %v2068_v58  ;;  %v779_v0 = vadd.f32 %v778_v39, %v2068_v58 }
 0x148   : > { %v996_v11 = vmul.f32 0.2, %v750_v63  ;;  %v997_v12 = vmul.f32 0.2, %v779_v0  ;;  %vm964_vm13 = vcmp.gt.f32.partialorder %v750_v63, 0.0  ;;  %vm965_vm14 = vcmp.gt.f32.partialorder %v779_v0, 0.0 }
 0x14a   : > { %v1028_v20 = vsel %vm964_vm13, %v750_v63, %v996_v11  ;;  %v1029_v21 = vsel %vm965_vm14, %v779_v0, %v997_v12 }
 0x14d   : > { %v752_v42 = vpop.f32.mrf.mxu0  ;;  %v781_v43 = vpop.f32.mrf.mxu1 }
 0x14e   : > { %v753_v54 = vadd.f32 %v752_v42, %v2064_v53  ;;  %v782_v55 = vadd.f32 %v781_v43, %v2064_v53 }
 0x150   : > { %v1004_v3 = vmul.f32 0.2, %v753_v54  ;;  %v1005_v4 = vmul.f32 0.2, %v782_v55  ;;  %vm972_vm10 = vcmp.gt.f32.partialorder %v753_v54, 0.0  ;;  %vm973_vm11 = vcmp.gt.f32.partialorder %v782_v55, 0.0 }
 0x151   : > { %v2056_v45 = vpop.f32.mrf.mxu2  ;;  %v2058_v44 = vpop.f32.mrf.mxu3 }
 0x152   : > { %v1036_v15 = vsel %vm972_vm10, %v753_v54, %v1004_v3  ;;  %v1037_v16 = vsel %vm973_vm11, %v782_v55, %v1005_v4  ;;  %v808_v26 = vadd.f32 %v2056_v45, %v2068_v58  ;;  %v837_v29 = vadd.f32 %v2058_v44, %v2068_v58 }
 0x154   : > { %v998_v39 = vmul.f32 0.2, %v808_v26  ;;  %v999_v42 = vmul.f32 0.2, %v837_v29 }
 0x155   : > { %v755_v46 = vpop.f32.mrf.mxu0  ;;  %v784_v47 = vpop.f32.mrf.mxu1 }
 0x156   : > { %v756_v51 = vadd.f32 %v755_v46, %v2060_v48  ;;  %v785_v52 = vadd.f32 %v784_v47, %v2060_v48 }
 0x158   : > { %v1012_v61 = vmul.f32 0.2, %v756_v51  ;;  %v1013_v62 = vmul.f32 0.2, %v785_v52  ;;  %vm980_vm6 = vcmp.gt.f32.partialorder %v756_v51, 0.0  ;;  %vm981_vm7 = vcmp.gt.f32.partialorder %v785_v52, 0.0 }
 0x159   : > { %v810_v49 = vpop.f32.mrf.mxu2  ;;  %v839_v50 = vpop.f32.mrf.mxu3 }
 0x15a   : > { %v1044_v9 = vsel %vm980_vm6, %v756_v51, %v1012_v61  ;;  %v1045_v10 = vsel %vm981_vm7, %v785_v52, %v1013_v62  ;;  %v811_v31 = vadd.f32 %v810_v49, %v2064_v53  ;;  %v840_v24 = vadd.f32 %v839_v50, %v2064_v53 }
 0x15b   : > { %vm966_vm6 = vcmp.gt.f32.partialorder %v808_v26, 0.0  ;;  %vm967_vm7 = vcmp.gt.f32.partialorder %v837_v29, 0.0 }
 0x15c   : > { %v1006_v33 = vmul.f32 0.2, %v811_v31  ;;  %v1007_v34 = vmul.f32 0.2, %v840_v24  ;;  %vm974_vm4 = vcmp.gt.f32.partialorder %v811_v31, 0.0  ;;  %vm975_vm5 = vcmp.gt.f32.partialorder %v840_v24, 0.0 }
 0x15d   : > { %v758_v56 = vpop.f32.mrf.mxu0  ;;  %v787_v57 = vpop.f32.mrf.mxu1  ;;  %v1030_v50 = vsel %vm966_vm6, %v808_v26, %v998_v39  ;;  %v1031_v51 = vsel %vm967_vm7, %v837_v29, %v999_v42 }
 0x15e   : > { %v759_v59 = vadd.f32 %v758_v56, %v2054_v41  ;;  %v788_v60 = vadd.f32 %v787_v57, %v2054_v41  ;;  %v1038_v47 = vsel %vm974_vm4, %v811_v31, %v1006_v33  ;;  %v1039_v49 = vsel %vm975_vm5, %v840_v24, %v1007_v34 }
 0x160   : > { %vm988_vm8 = vcmp.gt.f32.partialorder %v759_v59, 0.0  ;;  %v1020_v1 = vmul.f32 0.2, %v759_v59  ;;  %vm989_vm9 = vcmp.gt.f32.partialorder %v788_v60, 0.0  ;;  %v1021_v2 = vmul.f32 0.2, %v788_v60 }
 0x161   : > { %v813_v5 = vpop.f32.mrf.mxu2  ;;  %v842_v6 = vpop.f32.mrf.mxu3 }
 0x162   : > { %v1052_v7 = vsel %vm988_vm8, %v759_v59, %v1020_v1  ;;  %v1053_v8 = vsel %vm989_vm9, %v788_v60, %v1021_v2  ;;  %v814_v37 = vadd.f32 %v813_v5, %v2060_v48  ;;  %v843_v17 = vadd.f32 %v842_v6, %v2060_v48 }
 0x163   : > { %1083 = vmatpush.msra.mxu0 %v1052_v7  ;;  %1103 = vmatpush.msra.mxu1 %v1053_v8 }
 0x164   : > { %v1014_v36 = vmul.f32 0.2, %v814_v37  ;;  %v1015_v27 = vmul.f32 0.2, %v843_v17  ;;  %vm982_vm2 = vcmp.gt.f32.partialorder %v814_v37, 0.0  ;;  %vm983_vm3 = vcmp.gt.f32.partialorder %v843_v17, 0.0 }
 0x165   : > { %1084 = vmatpush.msra.mxu0 %v1044_v9  ;;  %1104 = vmatpush.msra.mxu1 %v1045_v10 }
 0x166   : > { %v2074_v13 = vpop.f32.mrf.mxu0  ;;  %v2076_v14 = vpop.f32.mrf.mxu1  ;;  %v1046_v43 = vsel %vm982_vm2, %v814_v37, %v1014_v36  ;;  %v1047_v45 = vsel %vm983_vm3, %v843_v17, %v1015_v27 }
 0x167   : > { %1085 = vmatpush.msra.mxu0 %v1036_v15  ;;  %1105 = vmatpush.msra.mxu1 %v1037_v16  ;;  %v866_v2 = vadd.f32 %v2074_v13, %v2068_v58  ;;  %v895_v3 = vadd.f32 %v2076_v14, %v2068_v58 }
 0x169   : > { %v816_v22 = vpop.f32.mrf.mxu2  ;;  %v845_v23 = vpop.f32.mrf.mxu3  ;;  %1086 = vmatpush.msra.mxu0 %v1028_v20  ;;  %1106 = vmatpush.msra.mxu1 %v1029_v21  ;;  %v1000_v13 = vmul.f32 0.2, %v866_v2  ;;  %v1001_v14 = vmul.f32 0.2, %v895_v3 }
 0x16a   : > { %v817_v30 = vadd.f32 %v816_v22, %v2054_v41  ;;  %v846_v25 = vadd.f32 %v845_v23, %v2054_v41  ;;  %1567 = vmatmul.msk.f32.vlgmr.msra.gmra.mxu0 %vm719_vm12, %v2083_v19  ;;  %1568 = vmatmul.msk.f32.vlgmr.msra.gmra.mxu1 %vm719_vm12, %v2083_v19 }
 0x16c   : > { %vm990_vm15 = vcmp.gt.f32.partialorder %v817_v30, 0.0  ;;  %v1022_v28 = vmul.f32 0.2, %v817_v30  ;;  %vm991_vm1 = vcmp.gt.f32.partialorder %v846_v25, 0.0  ;;  %v1023_v32 = vmul.f32 0.2, %v846_v25 }
 0x16e   : > { %v868_v35 = vpop.f32.mrf.mxu0  ;;  %v897_v38 = vpop.f32.mrf.mxu1  ;;  %v1054_v40 = vsel %vm990_vm15, %v817_v30, %v1022_v28  ;;  %v1055_v18 = vsel %vm991_vm1, %v846_v25, %v1023_v32  ;;  %vm968_vm15 = vcmp.gt.f32.partialorder %v866_v2, 0.0  ;;  %vm969_vm1 = vcmp.gt.f32.partialorder %v895_v3, 0.0 }
 0x16f   : > { %1123 = vmatpush.msra.mxu2 %v1054_v40  ;;  %1143 = vmatpush.msra.mxu3 %v1055_v18  ;;  %v869_v62 = vadd.f32 %v868_v35, %v2064_v53  ;;  %v898_v63 = vadd.f32 %v897_v38, %v2064_v53  ;;  %v1032_v22 = vsel %vm968_vm15, %v866_v2, %v1000_v13 }
 0x170   : > { %v1033_v23 = vsel %vm969_vm1, %v895_v3, %v1001_v14 }
 0x171   : > { %1124 = vmatpush.msra.mxu2 %v1046_v43  ;;  %1144 = vmatpush.msra.mxu3 %v1047_v45  ;;  %v1008_v10 = vmul.f32 0.2, %v869_v62  ;;  %v1009_v11 = vmul.f32 0.2, %v898_v63  ;;  %vm976_vm13 = vcmp.gt.f32.partialorder %v869_v62, 0.0  ;;  %vm977_vm14 = vcmp.gt.f32.partialorder %v898_v63, 0.0 }
 0x172   : > { %v2097_v44 = vpop.f32.mrf.mxu2  ;;  %v2099_v46 = vpop.f32.mrf.mxu3 }
 0x173   : > { %1125 = vmatpush.msra.mxu2 %v1038_v47  ;;  %1145 = vmatpush.msra.mxu3 %v1039_v49  ;;  %v1040_v17 = vsel %vm976_vm13, %v869_v62, %v1008_v10  ;;  %v1041_v20 = vsel %vm977_vm14, %v898_v63, %v1009_v11  ;;  %v953_v27 = vadd.f32 %v2099_v46, %v2068_v58  ;;  %v1065_v46 = vpop.permute.xlu2 %1064 }
 0x174   : > { %v1067_v49 = vperm.slane %v1065_v46, 0 }
 0x175   : > { %1126 = vmatpush.msra.mxu2 %v1030_v50  ;;  %1146 = vmatpush.msra.mxu3 %v1031_v51  ;;  %v1003_v18 = vmul.f32 0.2, %v953_v27 }
 0x176   : > { %v871_v52 = vpop.f32.mrf.mxu0  ;;  %v900_v54 = vpop.f32.mrf.mxu1  ;;  %1569 = vmatmul.msk.f32.vlgmr.msra.gmra.mxu2 %vm719_vm12, %v2083_v19  ;;  %1570 = vmatmul.msk.f32.vlgmr.msra.gmra.mxu3 %vm719_vm12, %v2083_v19 }
 0x177   : > { %v872_v57 = vadd.f32 %v871_v52, %v2060_v48  ;;  %v901_v59 = vadd.f32 %v900_v54, %v2060_v48 }
 0x179   : > { %v1016_v4 = vmul.f32 0.2, %v872_v57  ;;  %v1017_v5 = vmul.f32 0.2, %v901_v59  ;;  %vm984_vm10 = vcmp.gt.f32.partialorder %v872_v57, 0.0  ;;  %vm985_vm11 = vcmp.gt.f32.partialorder %v901_v59, 0.0 }
 0x17a   : > { %v926_v55 = vpop.f32.mrf.mxu2  ;;  %v955_v56 = vpop.f32.mrf.mxu3 }
 0x17b   : > { %v1048_v16 = vsel %vm984_vm10, %v872_v57, %v1016_v4  ;;  %v1049_v37 = vsel %vm985_vm11, %v901_v59, %v1017_v5  ;;  %v927_v24 = vadd.f32 %v926_v55, %v2064_v53  ;;  %v956_v26 = vadd.f32 %v955_v56, %v2064_v53 }
 0x17d   : > { %v1011_v34 = vmul.f32 0.2, %v956_v26  ;;  %vm978_vm6 = vcmp.gt.f32.partialorder %v927_v24, 0.0  ;;  %vm979_vm7 = vcmp.gt.f32.partialorder %v956_v26, 0.0 }
 0x17e   : > { %v874_v60 = vpop.f32.mrf.mxu0  ;;  %v903_v61 = vpop.f32.mrf.mxu1 }
 0x17f   : > { %v875_v0 = vadd.f32 %v874_v60, %v2054_v41  ;;  %v904_v1 = vadd.f32 %v903_v61, %v2054_v41  ;;  %v1043_v43 = vsel %vm979_vm7, %v956_v26, %v1011_v34 }
 0x181   : > { %vm992_vm8 = vcmp.gt.f32.partialorder %v875_v0, 0.0  ;;  %v1024_v6 = vmul.f32 0.2, %v875_v0  ;;  %vm993_vm9 = vcmp.gt.f32.partialorder %v904_v1, 0.0  ;;  %v1025_v7 = vmul.f32 0.2, %v904_v1 }
 0x182   : > { %v929_v8 = vpop.f32.mrf.mxu2  ;;  %v958_v9 = vpop.f32.mrf.mxu3 }
 0x183   : > { %v1056_v12 = vsel %vm992_vm8, %v875_v0, %v1024_v6  ;;  %v1057_v15 = vsel %vm993_vm9, %v904_v1, %v1025_v7  ;;  %v930_v21 = vadd.f32 %v929_v8, %v2060_v48  ;;  %v959_v31 = vadd.f32 %v958_v9, %v2060_v48 }
 0x184   : > { %1163 = vmatpush.msrb.mxu0 %v1056_v12  ;;  %1183 = vmatpush.msrb.mxu1 %v1057_v15  ;;  %v924_v48 = vadd.f32 %v2097_v44, %v2068_v58  ;;  %vm971_vm9 = vcmp.gt.f32.partialorder %v953_v27, 0.0 }
 0x185   : > { %v1018_v28 = vmul.f32 0.2, %v930_v21  ;;  %v1019_v32 = vmul.f32 0.2, %v959_v31  ;;  %vm986_vm4 = vcmp.gt.f32.partialorder %v930_v21, 0.0  ;;  %vm987_vm5 = vcmp.gt.f32.partialorder %v959_v31, 0.0 }
 0x186   : > { %1164 = vmatpush.msrb.mxu0 %v1048_v16  ;;  %1184 = vmatpush.msrb.mxu1 %v1049_v37  ;;  %v1002_v40 = vmul.f32 0.2, %v924_v48  ;;  %vm970_vm8 = vcmp.gt.f32.partialorder %v924_v48, 0.0  ;;  %v1035_v44 = vsel %vm971_vm9, %v953_v27, %v1003_v18 }
 0x187   : > { %v1050_v39 = vsel %vm986_vm4, %v930_v21, %v1018_v28  ;;  %v1051_v58 = vsel %vm987_vm5, %v959_v31, %v1019_v32 }
 0x188   : > { %1165 = vmatpush.msrb.mxu0 %v1040_v17  ;;  %1185 = vmatpush.msrb.mxu1 %v1041_v20  ;;  %v1034_v45 = vsel %vm970_vm8, %v924_v48, %v1002_v40 }
 0x18a   : > { %v932_v30 = vpop.f32.mrf.mxu2  ;;  %v961_v25 = vpop.f32.mrf.mxu3  ;;  %1166 = vmatpush.msrb.mxu0 %v1032_v22  ;;  %1186 = vmatpush.msrb.mxu1 %v1033_v23 }
 0x18b   : > { %v933_v29 = vadd.f32 %v932_v30, %v2054_v41  ;;  %v962_v36 = vadd.f32 %v961_v25, %v2054_v41  ;;  %1571 = vmatmul.msk.f32.vlgmr.msrb.gmra.mxu0 %vm719_vm12, %v2083_v19  ;;  %1572 = vmatmul.msk.f32.vlgmr.msrb.gmra.mxu1 %vm719_vm12, %v2083_v19  ;;  %v1010_v41 = vmul.f32 0.2, %v927_v24 }
 0x18d   : > { %vm994_vm2 = vcmp.gt.f32.partialorder %v933_v29, 0.0  ;;  %v1026_v53 = vmul.f32 0.2, %v933_v29  ;;  %vm995_vm3 = vcmp.gt.f32.partialorder %v962_v36, 0.0  ;;  %v1027_v33 = vmul.f32 0.2, %v962_v36 }
 0x18e   : > { %v1042_v42 = vsel %vm978_vm6, %v927_v24, %v1010_v41 }
 0x18f   : > { %v1058_v35 = vsel %vm994_vm2, %v933_v29, %v1026_v53  ;;  %v1059_v38 = vsel %vm995_vm3, %v962_v36, %v1027_v33 }
 0x190   : > { %1203 = vmatpush.msrb.mxu2 %v1058_v35  ;;  %1223 = vmatpush.msrb.mxu3 %v1059_v38 }
 0x192   : > { %1204 = vmatpush.msrb.mxu2 %v1050_v39  ;;  %1224 = vmatpush.msrb.mxu3 %v1051_v58 }
 0x194   : > { %1205 = vmatpush.msrb.mxu2 %v1042_v42  ;;  %1225 = vmatpush.msrb.mxu3 %v1043_v43 }
 0x196   : > { %1206 = vmatpush.msrb.mxu2 %v1034_v45  ;;  %1226 = vmatpush.msrb.mxu3 %v1035_v44 }
 0x197   : > { %1573 = vmatmul.msk.f32.vlgmr.msrb.gmra.mxu2 %vm719_vm12, %v2083_v19  ;;  %1574 = vmatmul.msk.f32.vlgmr.msrb.gmra.mxu3 %vm719_vm12, %v2083_v19 }
 0x1e7   : > { %v1108_v47 = vpop.f32.mrf.mxu1  ;;  %v1088_v50 = vpop.f32.mrf.mxu0 }
 0x1e8   : > { %v1109_v51 = vadd.f32 %v1108_v47, %v1067_v49  ;;  %v1089_v52 = vadd.f32 %v1088_v50, %v1067_v49 }
 0x1ea   : > { %v1576_v54 = vmul.f32 -1.442695, %v1109_v51  ;;  %v1575_v57 = vmul.f32 -1.442695, %v1089_v52 }
 0x1ec   : > { %1630 = vpow2.f32 %v1576_v54 }
 0x1ed   : > { %1632 = vpow2.f32 %v1575_v57 }
 0x1f2   : > { %v1631_v63 = vpop.eup %1630 }
 0x1f3   : > { %v1633_v0 = vpop.eup %1632  ;;  %v2133_v19 = vadd.f32 1.0, %v1631_v63 }
 0x1f4   : > { %v2135_v5 = vadd.f32 1.0, %v1633_v0 }
 0x1f5   : > { %v1289_v35 = vand.u32 2147483648, %v2133_v19  ;;  %vm1283_vm10 = vweird.f32 %v2133_v19  ;;  %v1287_v58 = vand.u32 2147483647, %v2133_v19 }
 0x1f6   : > { %v1274_v41 = vand.u32 2147483648, %v2135_v5  ;;  %vm1268_vm11 = vweird.f32 %v2135_v5  ;;  %v1272_v45 = vand.u32 2147483647, %v2135_v5 }
 0x1f7   : > { %v1290_v46 = vor.u32 1.1754944e-38, %v1289_v35  ;;  %vm1288_vm1 = vcmp.eq.f32.partialorder %v1287_v58, 8.507059e+37 }
 0x1f9   : > { %v1128_v55 = vpop.f32.mrf.mxu2  ;;  %v1148_v56 = vpop.f32.mrf.mxu3 }
 0x1fa   : > { %v1129_v59 = vadd.f32 %v1128_v55, %v1067_v49  ;;  %v1149_v60 = vadd.f32 %v1148_v56, %v1067_v49 }
 0x1fc   : > { %v1577_v61 = vmul.f32 -1.442695, %v1129_v59  ;;  %v1578_v62 = vmul.f32 -1.442695, %v1149_v60 }
 0x1fe   : > { %1634 = vpow2.f32 %v1577_v61 }
 0x1ff   : > { %1636 = vpow2.f32 %v1578_v62 }
 0x200   : > { %1638 = vrcp.f32 %v2133_v19 }
 0x204   : > { %v1635_v8 = vpop.eup %1634 }
 0x205   : > { %v1637_v9 = vpop.eup %1636  ;;  %v2139_v10 = vadd.f32 1.0, %v1635_v8 }
 0x206   : > { %v2141_v11 = vadd.f32 1.0, %v1637_v9  ;;  %v2143_v12 = vpop.eup %1638 }
 0x207   : > { %v1279_v37 = vmul.f32 %v2143_v12, %v2133_v19  ;;  %vm1284_vm12 = vweird.f32 %v2143_v12  ;;  %v1302_v57 = vand.u32 2147483647, %v2139_v10  ;;  %v1304_v59 = vand.u32 2147483648, %v2139_v10 }
 0x208   : > { %v1168_v1 = vpop.f32.mrf.mxu0  ;;  %v1188_v2 = vpop.f32.mrf.mxu1  ;;  %vm2184_vm13 = vmor %vm1283_vm10, %vm1284_vm12  ;;  %v1319_v62 = vand.u32 2147483648, %v2141_v11  ;;  %v1317_v19 = vand.u32 2147483647, %v2141_v11  ;;  %vm1298_vm4 = vweird.f32 %v2139_v10  ;;  %vm1313_vm5 = vweird.f32 %v2141_v11 }
 0x209   : > { %v1169_v3 = vadd.f32 %v1168_v1, %v1067_v49  ;;  %v1189_v4 = vadd.f32 %v1188_v2, %v1067_v49  ;;  %v1280_v21 = vsub.f32 1.0, %v1279_v37  ;;  %vm2232_vm6 = vcmp.eq.f32.partialorder %v1302_v57, 8.507059e+37 }
 0x20a   : > { %v1320_v9 = vor.u32 1.1754944e-38, %v1319_v62  ;;  %vm2250_vm12 = vcmp.eq.f32.partialorder %v1317_v19, 8.507059e+37 }
 0x20b   : > { %v1579_v6 = vmul.f32 -1.442695, %v1169_v3  ;;  %v1580_v7 = vmul.f32 -1.442695, %v1189_v4  ;;  %v1281_v29 = vmul.f32 %v2143_v12, %v1280_v21 }
 0x20d   : > { %1640 = vpow2.f32 %v1579_v6  ;;  %v1282_v34 = vadd.f32 %v2143_v12, %v1281_v29  ;;  %v1305_v6 = vor.u32 1.1754944e-38, %v1304_v59 }
 0x20e   : > { %1642 = vpow2.f32 %v1580_v7 }
 0x20f   : > { %1644 = vrcp.f32 %v2135_v5  ;;  %v1286_v50 = vsel %vm2184_vm13, %v2143_v12, %v1282_v34 }
 0x210   : > { %1646 = vrcp.f32 %v2139_v10  ;;  %v2220_v0 = vsel %vm1288_vm1, %v1290_v46, %v1286_v50 }
 0x211   : > { %1648 = vrcp.f32 %v2141_v11  ;;  %v1391_v29 = vrot.slane %v2220_v0, 7 }
 0x213   : > { %v1641_v15 = vpop.eup %1640 }
 0x214   : > { %v1643_v13 = vpop.eup %1642  ;;  %v2146_v14 = vadd.f32 1.0, %v1641_v15 }
 0x215   : > { %v2148_v16 = vpop.eup %1644  ;;  %v2153_v17 = vadd.f32 1.0, %v1643_v13 }
 0x216   : > { %v1264_v20 = vmul.f32 %v2148_v16, %v2135_v5  ;;  %1650 = vrcp.f32 %v2146_v14  ;;  %v2159_v31 = vpop.eup %1646  ;;  %vm1269_vm14 = vweird.f32 %v2148_v16  ;;  %v1332_v12 = vand.u32 2147483647, %v2146_v14 }
 0x217   : > { %1652 = vrcp.f32 %v2153_v17  ;;  %v2161_v24 = vpop.eup %1648  ;;  %v1294_v28 = vmul.f32 %v2159_v31, %v2139_v10  ;;  %vm2210_vm15 = vmor %vm1268_vm11, %vm1269_vm14  ;;  %vm1299_vm2 = vweird.f32 %v2159_v31  ;;  %v1334_v15 = vand.u32 2147483648, %v2146_v14 }
 0x218   : > { %v1265_v26 = vsub.f32 1.0, %v1264_v20  ;;  %v1309_v32 = vmul.f32 %v2161_v24, %v2141_v11  ;;  %vm1314_vm3 = vweird.f32 %v2161_v24  ;;  %vm2236_vm7 = vmor %vm1298_vm4, %vm1299_vm2  ;;  %v1349_v13 = vand.u32 2147483648, %v2153_v17 }
 0x219   : > { %v1295_v40 = vsub.f32 1.0, %v1294_v28  ;;  %vm2243_vm8 = vmor %vm1313_vm5, %vm1314_vm3  ;;  %v1347_v37 = vand.u32 2147483647, %v2153_v17  ;;  %vm1328_vm11 = vweird.f32 %v2146_v14  ;;  %vm1343_vm13 = vweird.f32 %v2153_v17 }
 0x21a   : > { %v1208_v22 = vpop.f32.mrf.mxu2  ;;  %v1228_v23 = vpop.f32.mrf.mxu3  ;;  %v1266_v33 = vmul.f32 %v2148_v16, %v1265_v26  ;;  %v1310_v18 = vsub.f32 1.0, %v1309_v32  ;;  %vm1400_vm14 = vcmask 1042434   ;;  %vm2271_vm2 = vcmp.eq.f32.partialorder %v1332_v12, 8.507059e+37 }
 0x21b   : > { %v1209_v30 = vadd.f32 %v1208_v22, %v1067_v49  ;;  %v1229_v25 = vadd.f32 %v1228_v23, %v1067_v49  ;;  %v2193_v49 = vor.u32 1.1754944e-38, %v1274_v41  ;;  %v1296_v52 = vmul.f32 %v2159_v31, %v1295_v40 }
 0x21c   : > { %v2164_v27 = vpop.eup %1650  ;;  %v2189_v43 = vadd.f32 %v2148_v16, %v1266_v33  ;;  %v1311_v54 = vmul.f32 %v2161_v24, %v1310_v18  ;;  %vm1398_vm4 = vcmask 1040384   ;;  %vm2290_vm5 = vcmp.eq.f32.partialorder %v1272_v45, 8.507059e+37 }
 0x21d   : > { %v1581_v36 = vmul.f32 -1.442695, %v1209_v30  ;;  %v1582_v48 = vmul.f32 -1.442695, %v1229_v25  ;;  %v2170_v53 = vpop.eup %1652  ;;  %v1324_v38 = vmul.f32 %v2164_v27, %v2146_v14  ;;  %v1297_v2 = vadd.f32 %v2159_v31, %v1296_v52 }
 0x21e   : > { %v1339_v39 = vmul.f32 %v2170_v53, %v2153_v17  ;;  %v1271_v63 = vsel %vm2210_vm15, %v2148_v16, %v2189_v43  ;;  %v1312_v3 = vadd.f32 %v2161_v24, %v1311_v54  ;;  %vm1329_vm9 = vweird.f32 %v2164_v27 }
 0x21f   : > { %1654 = vpow2.f32 %v1581_v36  ;;  %v1325_v47 = vsub.f32 1.0, %v1324_v38  ;;  %vm1344_vm10 = vweird.f32 %v2170_v53  ;;  %v1301_v23 = vsel %vm2236_vm7, %v2159_v31, %v1297_v2  ;;  %vm2266_vm1 = vmor %vm1328_vm11, %vm1329_vm9 }
 0x220   : > { %1656 = vpow2.f32 %v1582_v48  ;;  %v1340_v55 = vsub.f32 1.0, %v1339_v39  ;;  %v1316_v30 = vsel %vm2243_vm8, %v2161_v24, %v1312_v3  ;;  %v1335_v48 = vor.u32 1.1754944e-38, %v1334_v15  ;;  %vm2275_vm3 = vmor %vm1343_vm13, %vm1344_vm10 }
 0x221   : > { %v1326_v1 = vmul.f32 %v2164_v27, %v1325_v47  ;;  %v1350_v31 = vor.u32 1.1754944e-38, %v1349_v13  ;;  %v1306_v32 = vsel %vm2232_vm6, %v1305_v6, %v1301_v23  ;;  %v1321_v33 = vsel %vm2250_vm12, %v1320_v9, %v1316_v30 }
 0x222   : > { %v1341_v4 = vmul.f32 %v2170_v53, %v1340_v55  ;;  %vm1348_vm6 = vcmp.eq.f32.partialorder %v1347_v37, 8.507059e+37  ;;  %v1393_v50 = vrot.slane %v1321_v33, 5  ;;  %v1276_v19 = vsel %vm2290_vm5, %v2193_v49, %v1271_v63 }
 0x223   : > { %v1327_v11 = vadd.f32 %v2164_v27, %v1326_v1  ;;  %v1399_v1 = vsel %vm1398_vm4, %v1276_v19, %v1391_v29 }
 0x224   : > { %v1342_v22 = vadd.f32 %v2170_v53, %v1341_v4 }
 0x225   : > { %v1655_v44 = vpop.eup %1654  ;;  %v1331_v41 = vsel %vm2266_vm1, %v2164_v27, %v1327_v11 }
 0x226   : > { %v1657_v51 = vpop.eup %1656  ;;  %v2200_v56 = vadd.f32 1.0, %v1655_v44  ;;  %v1346_v40 = vsel %vm2275_vm3, %v2170_v53, %v1342_v22  ;;  %v1336_v5 = vsel %vm2271_vm2, %v1335_v48, %v1331_v41  ;;  %v1392_v44 = vrot.slane %v1306_v32, 6 }
 0x227   : > { %v2204_v60 = vadd.f32 1.0, %v1657_v51  ;;  %v1351_v53 = vsel %vm1348_vm6, %v1350_v31, %v1346_v40  ;;  %v1394_v54 = vrot.slane %v1336_v5, 4  ;;  %vm1404_vm2 = vcmask 1044484  }
 0x228   : > { %1658 = vrcp.f32 %v2200_v56  ;;  %v1364_v34 = vand.u32 2147483648, %v2200_v56  ;;  %v1362_v39 = vand.u32 2147483647, %v2200_v56  ;;  %vm1358_vm9 = vweird.f32 %v2200_v56 }
 0x229   : > { %1660 = vrcp.f32 %v2204_v60  ;;  %v1379_v27 = vand.u32 2147483648, %v2204_v60  ;;  %v1377_v42 = vand.u32 2147483647, %v2204_v60  ;;  %vm1373_vm10 = vweird.f32 %v2204_v60 }
 0x22a   : > { %v1365_v46 = vor.u32 1.1754944e-38, %v1364_v34  ;;  %vm1363_vm13 = vcmp.eq.f32.partialorder %v1362_v39, 8.507059e+37  ;;  %v1395_v57 = vrot.slane %v1351_v53, 3  ;;  %vm1406_vm3 = vcmask 1046534  }
 0x22b   : > { %v1380_v51 = vor.u32 1.1754944e-38, %v1379_v27  ;;  %vm1378_vm1 = vcmp.eq.f32.partialorder %v1377_v42, 8.507059e+37  ;;  %v1401_v0 = vsel %vm1400_vm14, %v1392_v44, %v1393_v50  ;;  %vm1402_vm6 = vcmask 1041408  }
 0x22c   : > { %v1405_v2 = vsel %vm1404_vm2, %v1394_v54, %v1395_v57  ;;  %v1403_v4 = vsel %vm1402_vm6, %v1399_v1, %v1401_v0 }
 0x22e   : > { %v1659_v21 = vpop.eup %1658 }
 0x22f   : > { %v1661_v25 = vpop.eup %1660  ;;  %v1354_v26 = vmul.f32 %v1659_v21, %v2200_v56  ;;  %vm1359_vm7 = vweird.f32 %v1659_v21 }
 0x230   : > { %v1369_v28 = vmul.f32 %v1661_v25, %v2204_v60  ;;  %vm1374_vm8 = vweird.f32 %v1661_v25  ;;  %vm1360_vm12 = vmor %vm1358_vm9, %vm1359_vm7  ;;  %vm1408_vm7 = vcmask 1045508  }
 0x231   : > { %v1355_v17 = vsub.f32 1.0, %v1354_v26  ;;  %vm1375_vm11 = vmor %vm1373_vm10, %vm1374_vm8 }
 0x232   : > { %v1370_v35 = vsub.f32 1.0, %v1369_v28 }
 0x233   : > { %v1356_v18 = vmul.f32 %v1659_v21, %v1355_v17 }
 0x234   : > { %v1371_v58 = vmul.f32 %v1661_v25, %v1370_v35 }
 0x235   : > { %v1357_v45 = vadd.f32 %v1659_v21, %v1356_v18 }
 0x236   : > { %v1372_v47 = vadd.f32 %v1661_v25, %v1371_v58 }
 0x237   : > { %v1361_v52 = vsel %vm1360_vm12, %v1659_v21, %v1357_v45 }
 0x238   : > { %v1366_v55 = vsel %vm1363_vm13, %v1365_v46, %v1361_v52  ;;  %v1376_v56 = vsel %vm1375_vm11, %v1661_v25, %v1372_v47 }
 0x239   : > { %v1381_v59 = vsel %vm1378_vm1, %v1380_v51, %v1376_v56  ;;  %v1396_v62 = vrot.slane %v1366_v55, 2 }
 0x23a   : > { %v1397_v60 = vrot.slane %v1381_v59, 1 }
 0x23c   : > { %v1407_v3 = vsel %vm1406_vm3, %v1396_v62, %v1397_v60 }
 0x23d   : > { %v1409_v6 = vsel %vm1408_vm7, %v1405_v2, %v1407_v3 }
 0x23e   : > { %v1410_v7 = vsel %vm346_vm0, %v1403_v4, %v1409_v6 }
 0x23f   : > { %1412 = vst [vmem:[%s274_s10] sm:$0xff] %v1410_v7 }
 0x240   : > { %1689 = shalt.err (!%p1686_p3)
}
 0x241   : > { %1587 = dma.vmem_to_hbm [thread:$0]  (%p1805_p5), %s1427_s15, 128, %s1429_s16, %s1414_s14  }
 0x242 PF: > { %p1593_p4 = scmp.ge.s32.totalorder %s1724_s29, 2  ;;  %s1440_s24 = sand.u32 1, %s1712_s26  }
 0x243   : > { %s1441_s25 = scalar_lea.sflag [#allocation4], %s1440_s24 }
 0x244   : > { %p1590_p7 = pnand %p1593_p4, %p1809_p6 }
 0x246   : > { %p1591_p8 = pneg %p1590_p7 }
 0x248   : > { %1707 = dma.done.wait (%p1591_p8), %s1441_s25, 128  }
 0x249   : > { %1709 = vsyncadd (%p1591_p8), %s1441_s25, 4294967168  ;;  %p19_p9 = scmp.ge.s32.totalorder %s1793_s8, 4   ;;  %s2383_s26 = smov %s1716_s27 }
 0x24a   : > { %s2384_s27 = smov %s1720_s28  ;;  %s2385_s28 = smov %s1803_s11 }
 0x24b   : > { %s2386_s29 = smov %s1793_s8  ;;  %21 = sbr.rel (!%p19_p9) target bundleno = 6 (0x6), region = 86 }
 0x250   :  { %1447 = vsyncpa [#allocation4], 1 }
 0x251   :  { %1449 = vsyncpa [#allocation4 + $0x1], 1 }

</bundles_post_ra>
